<compile_context>
chip_gen: v7x
topology: tpu7x:2x2x1
jax: 0.10.0
libtpu: 0.0.40
codegen_flags: <defaults>
</compile_context>

<pallas_src>
import random

import numpy as np
import jax
import jax.numpy as jnp
from jax.experimental import pallas as pl
from jax.experimental.pallas import tpu as pltpu


def _round_up(x, m):
    return ((x + m - 1) // m) * m


# ----------------------------------------------------------------------------
# Kernel: tiled (mask @ emb), f32 accumulation directly in the resident out
# tile, per-row 1/num_neigh applied at the finalize step.
# ----------------------------------------------------------------------------
def _mean_agg_kernel(mask_ref, emb_ref, inv_ref, out_ref):
    k = pl.program_id(2)

    @pl.when(k == 0)
    def _():
        out_ref[...] = jnp.zeros_like(out_ref)

    # bf16 x bf16 -> f32 on the MXU, accumulated into the resident f32 tile.
    out_ref[...] += jnp.dot(mask_ref[...], emb_ref[...],
                            preferred_element_type=jnp.float32)

    @pl.when(k == pl.num_programs(2) - 1)
    def _():
        # inv_ref is (tB, 1) f32 -> broadcasts over the (tB, tD) out tile.
        out_ref[...] *= inv_ref[...]


# ----------------------------------------------------------------------------
# Wrapper: tile selection + padding + pallas_call.
# ----------------------------------------------------------------------------
_VMEM_TILE_BUDGET = 24 * 1024 * 1024   # double-buffered tile footprint cap
_VMEM_LIMIT_BYTES = 32 * 1024 * 1024   # raise v5e's 16 MiB scoped default


def _tile_footprint_bytes(tB, tU, tD):
    # Every operand (and the output) is double-buffered by the pipeline.
    return 2 * (tB * tU * 2      # mask  bf16
                + tU * tD * 2    # emb   bf16
                + tB * 4         # 1/deg f32 (tB, 1)
                + tB * tD * 4)   # out   f32 (resident accumulator)


def mean_aggregate_pallas(mask_np, embed_np, *, tb=1024, td=512, tu=2048):
    """mask_np: (B, U) 0/1 float, embed_np: (U, D) float -> (B, D) f32.

    Equivalent to PyTorch's  mask.div(mask.sum(1, keepdim=True)).mm(embed),
    except zero-degree rows return 0 instead of NaN (documented divergence).
    """
    mask_np = np.asarray(mask_np, dtype=np.float32)
    embed_np = np.asarray(embed_np, dtype=np.float32)
    B, U = mask_np.shape
    U2, D = embed_np.shape
    assert U == U2

    # 1/num_neigh in f32 on the host (padded / empty rows -> 0).
    deg = mask_np.sum(axis=1, keepdims=True)
    inv_np = np.where(deg > 0, 1.0 / np.maximum(deg, 1.0), 0.0).astype(np.float32)

    # --- tile selection ------------------------------------------------------
    tB = min(tb, _round_up(B, 8))          # cover the whole batch if modest
    tU = min(tu, _round_up(U, 128))
    Dp128 = _round_up(D, 128)
    tD = min(td, Dp128)

    # v7x: if one B tile covers the batch, keep >= 2 D tiles (when D allows)
    # so the two parallel grid axes still shard work across both TensorCores.
    if tB >= _round_up(B, 8) and Dp128 // tD < 2 and Dp128 >= 256:
        tD = max(128, (Dp128 // 2) // 128 * 128)

    # Shrink until the double-buffered footprint fits the cross-generation
    # VMEM budget (scoped limit is raised to 32 MiB below; v7x has 64 MiB
    # physical per TC, so this also leaves compiler-scratch headroom there).
    while _tile_footprint_bytes(tB, tU, tD) > _VMEM_TILE_BUDGET:
        if tU > 512:
            tU = _round_up(tU // 2, 128)
        elif tB > 256:
            tB = _round_up(tB // 2, 8)
        elif tD > 128:
            tD = _round_up(tD // 2, 128)
        else:
            break

    Bp, Up, Dp = _round_up(B, tB), _round_up(U, tU), _round_up(D, tD)

    # Host-side padding (free) + host-side bf16 cast, so only bf16 bytes of
    # the big operands ever hit HBM.
    bf16 = jnp.bfloat16
    mask_p = np.zeros((Bp, Up), dtype=np.float32)
    mask_p[:B, :U] = mask_np
    emb_p = np.zeros((Up, Dp), dtype=np.float32)
    emb_p[:U, :D] = embed_np
    inv_p = np.zeros((Bp, 1), dtype=np.float32)
    inv_p[:B, :] = inv_np

    mask_d = jnp.asarray(mask_p.astype(bf16))
    emb_d = jnp.asarray(emb_p.astype(bf16))
    inv_d = jnp.asarray(inv_p)

    grid = (Bp // tB, Dp // tD, Up // tU)   # reduction axis (U) last

    out_p = pl.pallas_call(
        _mean_agg_kernel,
        out_shape=jax.ShapeDtypeStruct((Bp, Dp), jnp.float32),
        grid_spec=pltpu.PrefetchScalarGridSpec(
            num_scalar_prefetch=0,
            grid=grid,
            in_specs=[
                pl.BlockSpec((tB, tU), lambda i, j, k: (i, k)),   # mask tile
                pl.BlockSpec((tU, tD), lambda i, j, k: (k, j)),   # emb tile
                pl.BlockSpec((tB, 1), lambda i, j, k: (i, 0)),    # 1/deg col
            ],
            out_specs=pl.BlockSpec((tB, tD), lambda i, j, k: (i, j)),
        ),
        compiler_params=pltpu.CompilerParams(
            dimension_semantics=("parallel", "parallel", "arbitrary"),
            vmem_limit_bytes=_VMEM_LIMIT_BYTES),
    )(mask_d, emb_d, inv_d)
    return out_p[:B, :D]


# ----------------------------------------------------------------------------
# Python/JAX replica of MeanAggregator.forward; hot path runs in Pallas.
# ----------------------------------------------------------------------------
def mean_aggregator_forward(nodes, to_neighs, features_table,
                            num_sample=10, gcn=False, seed=0):
    """nodes: list of ids; to_neighs: list of neighbor-id sets;
    features_table: (num_nodes, feat_dim) array (features(ids) == table[ids])."""
    rng = random.Random(seed)  # deterministic stand-in for `random.sample`
    if num_sample is not None:
        samp_neighs = [
            set(rng.sample(sorted(to_neigh), num_sample))
            if len(to_neigh) >= num_sample else set(to_neigh)
            for to_neigh in to_neighs
        ]
    else:
        samp_neighs = [set(t) for t in to_neighs]
    if gcn:
        samp_neighs = [sn | {nodes[i]} for i, sn in enumerate(samp_neighs)]

    unique_nodes_list = sorted(set.union(*samp_neighs))  # sorted: deterministic
    unique_nodes = {n: i for i, n in enumerate(unique_nodes_list)}

    B, U = len(samp_neighs), len(unique_nodes_list)
    mask = np.zeros((B, U), dtype=np.float32)
    for i, sn in enumerate(samp_neighs):
        for n in sn:
            mask[i, unique_nodes[n]] = 1.0

    embed_matrix = np.asarray(features_table, dtype=np.float32)[
        np.asarray(unique_nodes_list, dtype=np.int64)
    ]

    return mean_aggregate_pallas(mask, embed_matrix)


if __name__ == "__main__":
    # Small synthetic graph: 32 nodes, 32-dim features, batch of 8 nodes.
    num_nodes, feat_dim, batch, num_sample = 32, 32, 8, 4

    key = jax.random.PRNGKey(0)
    features_table = jax.random.normal(key, (num_nodes, feat_dim), jnp.float32)
    features_np = np.asarray(features_table)

    graph_rng = random.Random(0)
    nodes = list(range(batch))
    to_neighs = [
        set(graph_rng.sample(range(num_nodes), graph_rng.randint(2, 8)))
        for _ in nodes
    ]

    out = mean_aggregator_forward(nodes, to_neighs, features_np,
                                  num_sample=num_sample, gcn=False, seed=0)
    out = jax.block_until_ready(out)

    # Pure-numpy f32 reference of the hot path (kernel uses bf16 operands,
    # f32 accumulate + f32 1/deg scaling -> loose-ish tolerance).
    rng = random.Random(0)
    samp_neighs = [
        set(rng.sample(sorted(t), num_sample)) if len(t) >= num_sample else set(t)
        for t in to_neighs
    ]
    uniq = sorted(set.union(*samp_neighs))
    idx = {n: i for i, n in enumerate(uniq)}
    mask_ref = np.zeros((batch, len(uniq)), np.float32)
    for i, sn in enumerate(samp_neighs):
        for n in sn:
            mask_ref[i, idx[n]] = 1.0
    mask_ref = mask_ref / mask_ref.sum(1, keepdims=True)
    ref = mask_ref @ features_np[np.asarray(uniq)]
    np.testing.assert_allclose(np.asarray(out), ref, rtol=2e-2, atol=2e-2)

    print("KERNEL_OK")
</pallas_src>

<mosaic_0001>
module attributes {stable_mosaic.version = 11 : i64} {
  func.func @_mean_agg_kernel(%arg0: i32, %arg1: i32, %arg2: i32, %arg3: memref<8x128xbf16, #tpu.memory_space<vmem>>, %arg4: memref<128x128xbf16, #tpu.memory_space<vmem>>, %arg5: memref<8x1xf32, #tpu.memory_space<vmem>>, %arg6: memref<8x128xf32, #tpu.memory_space<vmem>>) attributes {dimension_semantics = [#tpu.dimension_semantics<parallel>, #tpu.dimension_semantics<parallel>, #tpu.dimension_semantics<arbitrary>], iteration_bounds = array<i64: 1, 1, 1>, scalar_prefetch = 0 : i64, scratch_operands = 0 : i64, tpu.core_type = #tpu.core_type<tc>, window_params = [{transform_indices = @transform_0, window_bounds = array<i64: 8, 128>}, {transform_indices = @transform_1, window_bounds = array<i64: 128, 128>}, {transform_indices = @transform_2, window_bounds = array<i64: 8, 1>}, {transform_indices = @transform_3, window_bounds = array<i64: 8, 128>}]} {
    %c0_i32 = arith.constant 0 : i32
    %0 = arith.cmpi eq, %arg2, %c0_i32 : i32
    %1 = arith.extui %0 : i1 to i32
    %c0_i32_0 = arith.constant 0 : i32
    %2 = arith.cmpi ne, %1, %c0_i32_0 : i32
    scf.if %2 {
      %cst_10 = arith.constant 0.000000e+00 : f32
      %12 = vector.broadcast %cst_10 : f32 to vector<8x128xf32>
      %c0_11 = arith.constant 0 : index
      %c0_12 = arith.constant 0 : index
      %13 = vector.load %arg6[%c0_11, %c0_12] : memref<8x128xf32, #tpu.memory_space<vmem>>, vector<8x128xf32>
      tpu.vector_store %arg6[%c0_11, %c0_12], %12 {strides = array<i32>} : memref<8x128xf32, #tpu.memory_space<vmem>>, vector<8x128xf32>,
    } else {
    }
    %c0 = arith.constant 0 : index
    %c0_1 = arith.constant 0 : index
    %3 = vector.load %arg6[%c0, %c0_1] : memref<8x128xf32, #tpu.memory_space<vmem>>, vector<8x128xf32>
    %c0_2 = arith.constant 0 : index
    %c0_3 = arith.constant 0 : index
    %4 = vector.load %arg3[%c0_2, %c0_3] : memref<8x128xbf16, #tpu.memory_space<vmem>>, vector<8x128xbf16>
    %c0_4 = arith.constant 0 : index
    %c0_5 = arith.constant 0 : index
    %5 = vector.load %arg4[%c0_4, %c0_5] : memref<128x128xbf16, #tpu.memory_space<vmem>>, vector<128x128xbf16>
    %cst = arith.constant dense<0.000000e+00> : vector<8x128xf32>
    %6 = tpu.matmul %4, %5, %cst {dimension_numbers = #tpu.dot_dimension_numbers<[1], [0], [0], [1], [0, 0, 1, 1], [], []>} : vector<8x128xbf16>, vector<128x128xbf16>, vector<8x128xf32> -> vector<8x128xf32>
    %7 = arith.addf %3, %6 : vector<8x128xf32>
    %c0_6 = arith.constant 0 : index
    %c0_7 = arith.constant 0 : index
    %8 = vector.load %arg6[%c0_6, %c0_7] : memref<8x128xf32, #tpu.memory_space<vmem>>, vector<8x128xf32>
    tpu.vector_store %arg6[%c0_6, %c0_7], %7 {strides = array<i32>} : memref<8x128xf32, #tpu.memory_space<vmem>>, vector<8x128xf32>,
    %c0_i32_8 = arith.constant 0 : i32
    %9 = arith.cmpi eq, %arg2, %c0_i32_8 : i32
    %10 = arith.extui %9 : i1 to i32
    %c0_i32_9 = arith.constant 0 : i32
    %11 = arith.cmpi ne, %10, %c0_i32_9 : i32
    scf.if %11 {
      %c0_10 = arith.constant 0 : index
      %c0_11 = arith.constant 0 : index
      %12 = vector.load %arg6[%c0_10, %c0_11] : memref<8x128xf32, #tpu.memory_space<vmem>>, vector<8x128xf32>
      %c0_12 = arith.constant 0 : index
      %c0_13 = arith.constant 0 : index
      %13 = vector.load %arg5[%c0_12, %c0_13] : memref<8x1xf32, #tpu.memory_space<vmem>>, vector<8x1xf32>
      %14 = vector.broadcast %13 : vector<8x1xf32> to vector<8x128xf32>
      %15 = arith.mulf %12, %14 : vector<8x128xf32>
      %c0_14 = arith.constant 0 : index
      %c0_15 = arith.constant 0 : index
      %16 = vector.load %arg6[%c0_14, %c0_15] : memref<8x128xf32, #tpu.memory_space<vmem>>, vector<8x128xf32>
      tpu.vector_store %arg6[%c0_14, %c0_15], %15 {strides = array<i32>} : memref<8x128xf32, #tpu.memory_space<vmem>>, vector<8x128xf32>,
    } else {
    }
    return
  }
  func.func @transform_0(%arg0: i32, %arg1: i32, %arg2: i32) -> (i32, i32) {
    %c0_i32 = arith.constant 0 : i32
    return %arg0, %arg2 : i32, i32
  }
  func.func @transform_1(%arg0: i32, %arg1: i32, %arg2: i32) -> (i32, i32) {
    %c0_i32 = arith.constant 0 : i32
    return %arg2, %arg1 : i32, i32
  }
  func.func @transform_2(%arg0: i32, %arg1: i32, %arg2: i32) -> (i32, i32) {
    %c0_i32 = arith.constant 0 : i32
    %c0_i32_0 = arith.constant 0 : i32
    return %arg0, %c0_i32 : i32, i32
  }
  func.func @transform_3(%arg0: i32, %arg1: i32, %arg2: i32) -> (i32, i32) {
    %c0_i32 = arith.constant 0 : i32
    return %arg0, %arg1 : i32, i32
  }
}

</mosaic_0001>

<bundles_post_ra>
// kernel: tpu_custom_call.1
= control target key start
LH: loop header
LB: loop body
LE: loop exit
PB: predicated region body
PF: predicated region fallthrough
CT: control target
= control target key end

     0   :  { %8 = vsyncpa [#allocation3], 0  ;;  %s328_s0 = inlined_call_operand.vmem [shape: bf16[8,128], index: 0, kind: input, shape index: {}]   ;;  %s329_s1 = inlined_call_operand.hbm [shape: bf16[128,128], index: 1, kind: input, shape index: {}]   ;;  %s330_s2 = inlined_call_operand.vmem [shape: f32[8,1], index: 2, kind: input, shape index: {}]   ;;  %s331_s3 = inlined_call_operand.hbm [shape: f32[8,128], index: 3, kind: output, shape index: {}]  }
   0x1   :  { %9 = vsyncpa [#allocation4], 0  ;;  %s271_s12 = smov [#allocation2]   ;;  %s223_s16 = scalar_lea.hbm %s329_s1, 1024 }
   0x2   :  { %s17_s13 = sshll.u32 %s271_s12, 4  ;;  %p224_p0 = scmp.ne.s32.totalorder %s329_s1, %s223_s16  ;;  %s18_s13 = int_to_ptr.vmem [resolvable:$true] %s17_s13 }
   0x3   :  { %p227_p1 = scmp.lt.u32.totalorder %s223_s16, %s329_s1 }
   0x5   :  { %p229_p2 = pnand %p227_p1, %p224_p0 }
   0x7   :  { %232 = shalt.err (!%p229_p2)
}
   0x8   :  { %s233_s21 = scalar_lea.vmem %s18_s13, 1024  ;;  %p238_p4 = scmp.lt.s32.totalorder %s18_s13, %s18_s13 }
   0x9   :  { %p234_p3 = scmp.ne.s32.totalorder %s18_s13, %s233_s21  ;;  %p239_p5 = scmp.lt.s32.totalorder %s233_s21, %s233_s21 }
   0xb   :  { %p240_p6 = por %p239_p5, %p238_p4 }
   0xd   :  { %p241_p7 = pnand %p240_p6, %p234_p3 }
   0xf   :  { %244 = shalt.err (!%p241_p7)
}
  0x10   :  { %s272_s22 = smov 64   ;;  %s273_s23 = smov 4  }
  0x11   :  { %23 = dma.hbm_to_vmem [thread:$0]  %s329_s1, 1024, %s18_s13, [#allocation3], %s272_s22, %s272_s22, %s273_s23  }
  0x12   :  { %267 = dma.done.wait [#allocation3], 1024  }
  0x13   :  { %268 = vsyncadd [#allocation3], 4294966272  ;;  %v274_v0 = vmov 0.0   ;;  %vm275_vm0 = vmmov 0   ;;  %v276_v1 = vmov 0   ;;  %v215_v2 = vld [vmem:[#allocation2] sm:$0xff]  }
  0x14   :  { %187 = vmatprep.subr.bf16.mxu0 %v274_v0  ;;  %203 = vmatprep.mubr.msk.bf16.mxu0 %vm275_vm0, %v274_v0  ;;  %v216_v3 = vld [vmem:[#allocation2 + $0x8] sm:$0xff]   ;;  %v217_v4 = vld [vmem:[#allocation2 + $0x10] sm:$0xff]   ;;  %v147_v5 = vld [vmem:[%s330_s2] sm:$0xff]  ;;  %s277_s2 = smov [#allocation5]  }
  0x15   :  { %214 = vset.pattern.permute.xlu0 %v276_v1  ;;  %188 = vmatpush3.bf16.msra.mxu0 %v215_v2  ;;  %v218_v6 = vld [vmem:[#allocation2 + $0x18] sm:$0xff]   ;;  %v219_v7 = vld [vmem:[#allocation2 + $0x20] sm:$0xff]   ;;  %v220_v8 = vld [vmem:[#allocation2 + $0x28] sm:$0xff]   ;;  %s161_s29 = sshll.u32 %s277_s2, 4  ;;  %s162_s29 = int_to_ptr.vmem [resolvable:$true] %s161_s29 }
  0x16   :  { %189 = vmatprep.subr.bf16.mxu0 %v274_v0  ;;  %150 = vperm.xlu0 %214, %v147_v5   ;;  %v221_v9 = vld [vmem:[#allocation2 + $0x30] sm:$0xff]   ;;  %v222_v10 = vld [vmem:[#allocation2 + $0x38] sm:$0xff]   ;;  %v36_v11 = vld [vmem:[%s328_s0] sm:$0xf]  ;;  %s245_s30 = scalar_lea.vmem %s162_s29, 128  ;;  %p250_p9 = scmp.lt.s32.totalorder %s162_s29, %s162_s29 }
  0x17   :  { %p246_p8 = scmp.ne.s32.totalorder %s162_s29, %s245_s30  ;;  %p251_p10 = scmp.lt.s32.totalorder %s245_s30, %s245_s30 }
  0x19   :  { %190 = vmatpush3.bf16.msra.mxu0 %v216_v3  ;;  %p252_p11 = por %p251_p10, %p250_p9 }
  0x1a   :  { %191 = vmatprep.subr.bf16.mxu0 %v274_v0 }
  0x1b   :  { %p253_p12 = pnand %p252_p11, %p246_p8 }
  0x1d   :  { %192 = vmatpush3.bf16.msra.mxu0 %v217_v4 }
  0x1e   :  { %193 = vmatprep.subr.bf16.mxu0 %v274_v0 }
  0x21   :  { %194 = vmatpush3.bf16.msra.mxu0 %v218_v6 }
  0x22   :  { %195 = vmatprep.subr.bf16.mxu0 %v274_v0 }
  0x25   :  { %196 = vmatpush3.bf16.msra.mxu0 %v219_v7 }
  0x26   :  { %197 = vmatprep.subr.bf16.mxu0 %v274_v0 }
  0x29   :  { %198 = vmatpush3.bf16.msra.mxu0 %v220_v8 }
  0x2a   :  { %199 = vmatprep.subr.bf16.mxu0 %v274_v0 }
  0x2d   :  { %200 = vmatpush3.bf16.msra.mxu0 %v221_v9 }
  0x2e   :  { %201 = vmatprep.subr.bf16.mxu0 %v274_v0 }
  0x31   :  { %202 = vmatpush3.bf16.msra.mxu0 %v222_v10 }
  0x34   :  { %204 = vmatmul.mubr.bf16.vlgmr.msra.gmra.mrb[0].mxu0 %v36_v11 }
  0x95   :  { %v151_v13 = vpop.permute.xlu0 %150 }
 0x107   :  { %v135_v12 = vpop.f32.mrb[0].mxu0 }
 0x108   :  { %v205_v14 = vpop.f32.mrb[1].mxu0  ;;  %v153_v17 = vmul.f32 %v151_v13, %v135_v12 }
 0x109   :  { %v138_v15 = vpop.f32.mrb[2].mxu0 }
 0x10a   :  { %v206_v16 = vpop.f32.mrb[3].mxu0  ;;  %154 = vst [vmem:[#allocation5] sm:$0xff] %v153_v17 }
 0x10b   :  { %256 = shalt.err (!%p253_p12)
}
 0x10c   :  { %s257_s5 = scalar_lea.hbm %s331_s3, 128 }
 0x10d   :  { %p258_p13 = scmp.ne.s32.totalorder %s331_s3, %s257_s5  ;;  %p261_p0 = scmp.lt.u32.totalorder %s257_s5, %s331_s3 }
 0x10f   :  { %p263_p1 = pnand %p261_p0, %p258_p13 }
 0x111   :  { %266 = shalt.err (!%p263_p1)
}
 0x112   :  { %164 = dma.vmem_to_hbm [thread:$0]  %s162_s29, 128, %s331_s3, [#allocation4]  }
 0x113   :  { %269 = dma.done.wait [#allocation4], 128  }
 0x114   :  { %270 = vsyncadd [#allocation4], 4294967168 }
 0x115   :  { %168 = vsyncpa [#allocation3], 1 }
 0x116   :  { %169 = vsyncpa [#allocation4], 1 }

</bundles_post_ra>
